<compile_context>
chip_gen: v7x
topology: tpu7x:2x2x1
jax: 0.10.0
libtpu: 0.0.40
codegen_flags: <defaults>
</compile_context>

<pallas_src>
import jax
import jax.numpy as jnp
from jax.experimental import pallas as pl
from jax.experimental.pallas import tpu as pltpu

LANE = 128


def _round_up(x, m):
    return (x + m - 1) // m * m


def discriminator_kernel(x_ref, w1_ref, b1_ref, w2_ref, b2_ref, out_ref):
    # Layer 1: Linear(img_dim -> 128). bf16 operands on the MXU, f32 accumulate.
    h = jnp.dot(x_ref[...], w1_ref[...], preferred_element_type=jnp.float32)
    h = h + b1_ref[...]                      # (1, hidden) bias broadcasts over rows
    h = jnp.maximum(h, 0.1 * h)              # LeakyReLU(0.1), single VALU op

    # Layer 2: Linear(128 -> 1, lane-padded to 128) + Sigmoid (EUP exp + recip).
    y = jnp.dot(h.astype(w2_ref.dtype), w2_ref[...],
                preferred_element_type=jnp.float32)
    y = y + b2_ref[...]
    out_ref[...] = (1.0 / (1.0 + jnp.exp(-y))).astype(out_ref.dtype)


def discriminator_forward(x, w1, b1, w2, b2, *, block_m=256):
    batch, img_dim = x.shape
    hidden = w1.shape[1]
    out_dim = w2.shape[1]

    # --- layout prep (pure JAX, outside the kernel) -------------------------
    # bf16 matmul operands: halves the dominant HBM->VMEM transfer and feeds
    # the MXU natively. Biases stay f32; epilogue math stays f32 (v5e-safe).
    x_b = x.astype(jnp.bfloat16)
    w1_b = w1.astype(jnp.bfloat16)
    w2_b = w2.astype(jnp.bfloat16)
    b1_f = b1.astype(jnp.float32)
    b2_f = b2.astype(jnp.float32)

    # Pad contraction dim (e.g. 784 -> 896) to a lane multiple; zeros are inert.
    k_pad = (-img_dim) % LANE
    if k_pad:
        x_b = jnp.pad(x_b, ((0, 0), (0, k_pad)))
        w1_b = jnp.pad(w1_b, ((0, k_pad), (0, 0)))
    k_dim = img_dim + k_pad

    # Pad the 1-wide output/weight column to 128 lanes for unmasked stores.
    n_pad = (-out_dim) % LANE
    if n_pad:
        w2_b = jnp.pad(w2_b, ((0, 0), (0, n_pad)))
        b2_f = jnp.pad(b2_f, ((0, 0), (0, n_pad)))
    n_dim = out_dim + n_pad

    # Batch tiling: single block for small batches, 256-row MXU-filling tiles
    # (sharded across TensorCores via "parallel") for large ones.
    tm = min(block_m, _round_up(batch, 16))
    m_pad = (-batch) % tm
    if m_pad:
        x_b = jnp.pad(x_b, ((0, m_pad), (0, 0)))
    m_dim = batch + m_pad
    grid_m = m_dim // tm

    out_padded = pl.pallas_call(
        discriminator_kernel,
        out_shape=jax.ShapeDtypeStruct((m_dim, n_dim), jnp.float32),
        grid=(grid_m,),
        in_specs=[
            pl.BlockSpec((tm, k_dim), lambda i: (i, 0)),       # x batch tile
            pl.BlockSpec((k_dim, hidden), lambda i: (0, 0)),   # w1 (resident)
            pl.BlockSpec((1, hidden), lambda i: (0, 0)),       # b1
            pl.BlockSpec((hidden, n_dim), lambda i: (0, 0)),   # w2 (lane-padded)
            pl.BlockSpec((1, n_dim), lambda i: (0, 0)),        # b2
        ],
        out_specs=pl.BlockSpec((tm, n_dim), lambda i: (i, 0)),
        compiler_params=pltpu.CompilerParams(
            dimension_semantics=("parallel",)),
    )(x_b, w1_b, b1_f, w2_b, b2_f)

    # Undo batch + lane padding.
    return out_padded[:batch, :out_dim]


def init_params(key, img_dim, hidden, out_dim):
    # Deterministic synthetic init (matching nn.Linear's uniform fan-in scaling).
    k1, k2, k3, k4 = jax.random.split(key, 4)
    lim1 = 1.0 / jnp.sqrt(jnp.float32(img_dim))
    lim2 = 1.0 / jnp.sqrt(jnp.float32(hidden))
    w1 = jax.random.uniform(k1, (img_dim, hidden), jnp.float32, -lim1, lim1)
    b1 = jax.random.uniform(k2, (1, hidden), jnp.float32, -lim1, lim1)
    w2 = jax.random.uniform(k3, (hidden, out_dim), jnp.float32, -lim2, lim2)
    b2 = jax.random.uniform(k4, (1, out_dim), jnp.float32, -lim2, lim2)
    return w1, b1, w2, b2


if __name__ == "__main__":
    key = jax.random.PRNGKey(0)
    k_params, k_x = jax.random.split(key)

    # MNIST-style discriminator: img_dim = 28*28 = 784, hidden = 128, out = 1.
    # batch=128 fills the MXU rows per pass (per perf review) while staying small.
    batch, img_dim, hidden, out_dim = 128, 784, 128, 1

    w1, b1, w2, b2 = init_params(k_params, img_dim, hidden, out_dim)
    x = jax.random.normal(k_x, (batch, img_dim), jnp.float32)

    out = discriminator_forward(x, w1, b1, w2, b2)
    out = jax.block_until_ready(out)

    # Pure-JAX f32 reference (PyTorch semantics); bf16 operands add small error.
    ref_h = x @ w1 + b1
    ref_h = jnp.where(ref_h >= 0, ref_h, 0.1 * ref_h)
    ref = jax.nn.sigmoid(ref_h @ w2 + b2)

    assert out.shape == (batch, out_dim)
    assert bool(jnp.all(jnp.isfinite(out)))
    assert jnp.allclose(out, ref, atol=2e-2, rtol=0.0), float(jnp.max(jnp.abs(out - ref)))

    print("KERNEL_OK")
</pallas_src>

<mosaic_0001>
module attributes {stable_mosaic.version = 11 : i64} {
  func.func @discriminator_kernel(%arg0: i32, %arg1: memref<128x896xbf16, #tpu.memory_space<vmem>>, %arg2: memref<896x128xbf16, #tpu.memory_space<vmem>>, %arg3: memref<1x128xf32, #tpu.memory_space<vmem>>, %arg4: memref<128x128xbf16, #tpu.memory_space<vmem>>, %arg5: memref<1x128xf32, #tpu.memory_space<vmem>>, %arg6: memref<128x128xf32, #tpu.memory_space<vmem>>) attributes {dimension_semantics = [#tpu.dimension_semantics<parallel>], iteration_bounds = array<i64: 1>, scalar_prefetch = 0 : i64, scratch_operands = 0 : i64, tpu.core_type = #tpu.core_type<tc>, window_params = [{transform_indices = @transform_0, window_bounds = array<i64: 128, 896>}, {pipeline_mode = #tpu.pipeline_mode<synchronous>, transform_indices = @transform_1, window_bounds = array<i64: 896, 128>}, {pipeline_mode = #tpu.pipeline_mode<synchronous>, transform_indices = @transform_2, window_bounds = array<i64: 1, 128>}, {pipeline_mode = #tpu.pipeline_mode<synchronous>, transform_indices = @transform_3, window_bounds = array<i64: 128, 128>}, {pipeline_mode = #tpu.pipeline_mode<synchronous>, transform_indices = @transform_4, window_bounds = array<i64: 1, 128>}, {transform_indices = @transform_5, window_bounds = array<i64: 128, 128>}]} {
    %c0 = arith.constant 0 : index
    %c0_0 = arith.constant 0 : index
    %0 = vector.load %arg1[%c0, %c0_0] : memref<128x896xbf16, #tpu.memory_space<vmem>>, vector<128x896xbf16>
    %c0_1 = arith.constant 0 : index
    %c0_2 = arith.constant 0 : index
    %1 = vector.load %arg2[%c0_1, %c0_2] : memref<896x128xbf16, #tpu.memory_space<vmem>>, vector<896x128xbf16>
    %cst = arith.constant dense<0.000000e+00> : vector<128x128xf32>
    %2 = tpu.matmul %0, %1, %cst {dimension_numbers = #tpu.dot_dimension_numbers<[1], [0], [0], [1], [0, 0, 1, 1], [], []>} : vector<128x896xbf16>, vector<896x128xbf16>, vector<128x128xf32> -> vector<128x128xf32>
    %c0_3 = arith.constant 0 : index
    %c0_4 = arith.constant 0 : index
    %3 = vector.load %arg3[%c0_3, %c0_4] : memref<1x128xf32, #tpu.memory_space<vmem>>, vector<1x128xf32>
    %4 = vector.broadcast %3 : vector<1x128xf32> to vector<128x128xf32>
    %5 = arith.addf %2, %4 : vector<128x128xf32>
    %cst_5 = arith.constant 1.000000e-01 : f32
    %6 = vector.broadcast %cst_5 : f32 to vector<128x128xf32>
    %7 = arith.mulf %6, %5 : vector<128x128xf32>
    %8 = arith.maximumf %5, %7 : vector<128x128xf32>
    %9 = arith.truncf %8 : vector<128x128xf32> to vector<128x128xbf16>
    %c0_6 = arith.constant 0 : index
    %c0_7 = arith.constant 0 : index
    %10 = vector.load %arg4[%c0_6, %c0_7] : memref<128x128xbf16, #tpu.memory_space<vmem>>, vector<128x128xbf16>
    %cst_8 = arith.constant dense<0.000000e+00> : vector<128x128xf32>
    %11 = tpu.matmul %9, %10, %cst_8 {dimension_numbers = #tpu.dot_dimension_numbers<[1], [0], [0], [1], [0, 0, 1, 1], [], []>} : vector<128x128xbf16>, vector<128x128xbf16>, vector<128x128xf32> -> vector<128x128xf32>
    %c0_9 = arith.constant 0 : index
    %c0_10 = arith.constant 0 : index
    %12 = vector.load %arg5[%c0_9, %c0_10] : memref<1x128xf32, #tpu.memory_space<vmem>>, vector<1x128xf32>
    %13 = vector.broadcast %12 : vector<1x128xf32> to vector<128x128xf32>
    %14 = arith.addf %11, %13 : vector<128x128xf32>
    %cst_11 = arith.constant 0.000000e+00 : f32
    %15 = vector.broadcast %cst_11 : f32 to vector<128x128xf32>
    %16 = arith.subf %15, %14 : vector<128x128xf32>
    %17 = math.exp %16 : vector<128x128xf32>
    %cst_12 = arith.constant 1.000000e+00 : f32
    %18 = vector.broadcast %cst_12 : f32 to vector<128x128xf32>
    %19 = arith.addf %18, %17 : vector<128x128xf32>
    %cst_13 = arith.constant 1.000000e+00 : f32
    %20 = vector.broadcast %cst_13 : f32 to vector<128x128xf32>
    %21 = arith.divf %20, %19 : vector<128x128xf32>
    %c0_14 = arith.constant 0 : index
    %c0_15 = arith.constant 0 : index
    %22 = vector.load %arg6[%c0_14, %c0_15] : memref<128x128xf32, #tpu.memory_space<vmem>>, vector<128x128xf32>
    tpu.vector_store %arg6[%c0_14, %c0_15], %21 {strides = array<i32>} : memref<128x128xf32, #tpu.memory_space<vmem>>, vector<128x128xf32>,
    return
  }
  func.func @transform_0(%arg0: i32) -> (i32, i32) {
    %c0_i32 = arith.constant 0 : i32
    %c0_i32_0 = arith.constant 0 : i32
    return %arg0, %c0_i32 : i32, i32
  }
  func.func @transform_1(%arg0: i32) -> (i32, i32) {
    %c0_i32 = arith.constant 0 : i32
    %c0_i32_0 = arith.constant 0 : i32
    %c0_i32_1 = arith.constant 0 : i32
    return %c0_i32, %c0_i32_0 : i32, i32
  }
  func.func @transform_2(%arg0: i32) -> (i32, i32) {
    %c0_i32 = arith.constant 0 : i32
    %c0_i32_0 = arith.constant 0 : i32
    %c0_i32_1 = arith.constant 0 : i32
    return %c0_i32, %c0_i32_0 : i32, i32
  }
  func.func @transform_3(%arg0: i32) -> (i32, i32) {
    %c0_i32 = arith.constant 0 : i32
    %c0_i32_0 = arith.constant 0 : i32
    %c0_i32_1 = arith.constant 0 : i32
    return %c0_i32, %c0_i32_0 : i32, i32
  }
  func.func @transform_4(%arg0: i32) -> (i32, i32) {
    %c0_i32 = arith.constant 0 : i32
    %c0_i32_0 = arith.constant 0 : i32
    %c0_i32_1 = arith.constant 0 : i32
    return %c0_i32, %c0_i32_0 : i32, i32
  }
  func.func @transform_5(%arg0: i32) -> (i32, i32) {
    %c0_i32 = arith.constant 0 : i32
    %c0_i32_0 = arith.constant 0 : i32
    return %arg0, %c0_i32 : i32, i32
  }
}

</mosaic_0001>

<bundles_post_ra>
// kernel: tpu_custom_call.1
= control target key start
LH: loop header
LB: loop body
LE: loop exit
PB: predicated region body
PF: predicated region fallthrough
CT: control target
= control target key end

     0   :  { %10 = vsyncpa [#allocation3], 0  ;;  %s2508_s0 = inlined_call_operand.hbm [shape: bf16[128,896], index: 0, kind: input, shape index: {}]   ;;  %s2509_s1 = inlined_call_operand.hbm [shape: bf16[896,128], index: 1, kind: input, shape index: {}]   ;;  %s2510_s2 = inlined_call_operand.vmem [shape: f32[1,128], index: 2, kind: input, shape index: {}]   ;;  %s2511_s3 = inlined_call_operand.hbm [shape: bf16[128,128], index: 3, kind: input, shape index: {}]   ;;  %s2512_s4 = inlined_call_operand.vmem [shape: f32[1,128], index: 4, kind: input, shape index: {}]   ;;  %s2513_s5 = inlined_call_operand.hbm [shape: f32[128,128], index: 5, kind: output, shape index: {}]  }
   0x1   :  { %11 = vsyncpa [#allocation6], 0 }
   0x2   :  { %12 = vsyncpa [#allocation4], 0  ;;  %s2318_s18 = smov [#allocation5]   ;;  %s2224_s22 = scalar_lea.hbm %s2509_s1, 7168 }
   0x3   :  { %s30_s19 = sshll.u32 %s2318_s18, 4  ;;  %p2225_p0 = scmp.ne.s32.totalorder %s2509_s1, %s2224_s22  ;;  %s31_s19 = int_to_ptr.vmem [resolvable:$true] %s30_s19 }
   0x4   :  { %p2228_p1 = scmp.lt.u32.totalorder %s2224_s22, %s2509_s1 }
   0x6   :  { %p2230_p2 = pnand %p2228_p1, %p2225_p0 }
   0x8   :  { %2233 = shalt.err (!%p2230_p2)
}
   0x9   :  { %s2234_s27 = scalar_lea.vmem %s31_s19, 7168  ;;  %p2239_p4 = scmp.lt.s32.totalorder %s31_s19, %s31_s19 }
   0xa   :  { %p2235_p3 = scmp.ne.s32.totalorder %s31_s19, %s2234_s27  ;;  %p2240_p5 = scmp.lt.s32.totalorder %s2234_s27, %s2234_s27 }
   0xc   :  { %p2241_p6 = por %p2240_p5, %p2239_p4 }
   0xe   :  { %p2242_p7 = pnand %p2241_p6, %p2235_p3 }
  0x10   :  { %2245 = shalt.err (!%p2242_p7)
}
  0x11   :  { %s2319_s28 = smov 64   ;;  %s2320_s29 = smov 4  }
  0x12   :  { %36 = dma.hbm_to_vmem [thread:$0]  %s2509_s1, 7168, %s31_s19, [#allocation6], %s2319_s28, %s2319_s28, %s2320_s29  }
  0x13   :  { %s2321_s7 = smov [#allocation2]   ;;  %s2246_s11 = scalar_lea.hbm %s2508_s0, 7168 }
  0x14   :  { %s18_s8 = sshll.u32 %s2321_s7, 4  ;;  %p2247_p8 = scmp.ne.s32.totalorder %s2508_s0, %s2246_s11  ;;  %s19_s8 = int_to_ptr.vmem [resolvable:$true] %s18_s8 }
  0x15   :  { %p2250_p9 = scmp.lt.u32.totalorder %s2246_s11, %s2508_s0 }
  0x17   :  { %p2252_p10 = pnand %p2250_p9, %p2247_p8 }
  0x19   :  { %2255 = shalt.err (!%p2252_p10)
}
  0x1a   :  { %s2256_s16 = scalar_lea.vmem %s19_s8, 7168  ;;  %p2261_p12 = scmp.lt.s32.totalorder %s19_s8, %s19_s8 }
  0x1b   :  { %p2257_p11 = scmp.ne.s32.totalorder %s19_s8, %s2256_s16  ;;  %p2262_p13 = scmp.lt.s32.totalorder %s2256_s16, %s2256_s16 }
  0x1d   :  { %p2263_p0 = por %p2262_p13, %p2261_p12 }
  0x1f   :  { %p2264_p1 = pnand %p2263_p0, %p2257_p11 }
  0x21   :  { %2267 = shalt.err (!%p2264_p1)
}
  0x22   :  { %s2322_s1 = smov 448   ;;  %s2323_s17 = smov 28  }
  0x23   :  { %24 = dma.hbm_to_vmem [thread:$0]  %s2508_s0, 7168, %s19_s8, [#allocation3], %s2322_s1, %s2322_s1, %s2323_s17  }
  0x24   :  { %s2324_s20 = smov [#allocation7]   ;;  %s2268_s24 = scalar_lea.hbm %s2511_s3, 1024 }
  0x25   :  { %s44_s21 = sshll.u32 %s2324_s20, 4  ;;  %p2269_p2 = scmp.ne.s32.totalorder %s2511_s3, %s2268_s24  ;;  %s45_s21 = int_to_ptr.vmem [resolvable:$true] %s44_s21 }
  0x26   :  { %p2272_p3 = scmp.lt.u32.totalorder %s2268_s24, %s2511_s3 }
  0x28   :  { %p2274_p4 = pnand %p2272_p3, %p2269_p2 }
  0x2a   :  { %2277 = shalt.err (!%p2274_p4)
}
  0x2b   :  { %s2278_s6 = scalar_lea.vmem %s45_s21, 1024  ;;  %p2283_p6 = scmp.lt.s32.totalorder %s45_s21, %s45_s21 }
  0x2c   :  { %p2279_p5 = scmp.ne.s32.totalorder %s45_s21, %s2278_s6  ;;  %p2284_p7 = scmp.lt.s32.totalorder %s2278_s6, %s2278_s6 }
  0x2e   :  { %p2285_p8 = por %p2284_p7, %p2283_p6 }
  0x30   :  { %p2286_p9 = pnand %p2285_p8, %p2279_p5 }
  0x32   :  { %2289 = shalt.err (!%p2286_p9)
}
  0x33   :  { %50 = dma.hbm_to_vmem [thread:$0]  %s2511_s3, 1024, %s45_s21, [#allocation6], %s2319_s28, %s2319_s28, %s2320_s29  }
  0x34   :  { %2312 = dma.done.wait [#allocation3], 7168  }
  0x35   :  { %2313 = vsyncadd [#allocation3], 4294960128 }
  0x36   :  { %2314 = dma.done.wait [#allocation6], 8192  }
  0x37   :  { %2315 = vsyncadd [#allocation6], 4294959104  ;;  %v2016_v0 = vld [vmem:[#allocation5 + $0x40] sm:$0xff]   ;;  %v2020_v4 = vld [vmem:[#allocation5 + $0x48] sm:$0xff]  }
  0x38   :  { %v2017_v1 = vld [vmem:[#allocation5] sm:$0xff]   ;;  %1718 = vmatprep.subr.bf16.mxu0 %v2016_v0  ;;  %v2021_v5 = vld [vmem:[#allocation5 + $0x8] sm:$0xff]   ;;  %v2024_v8 = vld [vmem:[#allocation5 + $0x50] sm:$0xff]  }
  0x39   :  { %v2018_v2 = vld [vmem:[#allocation5 + $0xc0] sm:$0xff]   ;;  %1719 = vmatpush3.bf16.msra.mxu0 %v2017_v1  ;;  %v2022_v6 = vld [vmem:[#allocation5 + $0xc8] sm:$0xff]   ;;  %v2025_v9 = vld [vmem:[#allocation5 + $0x10] sm:$0xff]  }
  0x3a   :  { %v2019_v3 = vld [vmem:[#allocation5 + $0x80] sm:$0xff]   ;;  %1782 = vmatprep.subr.bf16.mxu1 %v2018_v2  ;;  %1720 = vmatprep.subr.bf16.mxu0 %v2020_v4  ;;  %v2023_v7 = vld [vmem:[#allocation5 + $0x88] sm:$0xff]   ;;  %v2026_v10 = vld [vmem:[#allocation5 + $0xd0] sm:$0xff]  }
  0x3b   :  { %1783 = vmatpush3.bf16.msra.mxu1 %v2019_v3  ;;  %v2027_v11 = vld [vmem:[#allocation5 + $0x90] sm:$0xff]   ;;  %v2028_v12 = vld [vmem:[#allocation5 + $0x58] sm:$0xff]   ;;  %v2032_v16 = vld [vmem:[#allocation5 + $0x60] sm:$0xff]  }
  0x3c   :  { %1784 = vmatprep.subr.bf16.mxu1 %v2022_v6  ;;  %v2029_v13 = vld [vmem:[#allocation5 + $0x18] sm:$0xff]   ;;  %v2033_v17 = vld [vmem:[#allocation5 + $0x20] sm:$0xff]   ;;  %v2036_v20 = vld [vmem:[#allocation5 + $0x68] sm:$0xff]  }
  0x3d   :  { %1721 = vmatpush3.bf16.msra.mxu0 %v2021_v5  ;;  %v2030_v14 = vld [vmem:[#allocation5 + $0xd8] sm:$0xff]   ;;  %v2034_v18 = vld [vmem:[#allocation5 + $0xe0] sm:$0xff]   ;;  %v2037_v21 = vld [vmem:[#allocation5 + $0x28] sm:$0xff]  }
  0x3e   :  { %1722 = vmatprep.subr.bf16.mxu0 %v2024_v8  ;;  %v2031_v15 = vld [vmem:[#allocation5 + $0x98] sm:$0xff]   ;;  %v2035_v19 = vld [vmem:[#allocation5 + $0xa0] sm:$0xff]   ;;  %v2038_v22 = vld [vmem:[#allocation5 + $0xe8] sm:$0xff]  }
  0x3f   :  { %1785 = vmatpush3.bf16.msra.mxu1 %v2023_v7  ;;  %v2039_v23 = vld [vmem:[#allocation5 + $0xa8] sm:$0xff]   ;;  %v2040_v24 = vld [vmem:[#allocation5 + $0x70] sm:$0xff]   ;;  %v2044_v28 = vld [vmem:[#allocation5 + $0x78] sm:$0xff]  }
  0x40   :  { %1786 = vmatprep.subr.bf16.mxu1 %v2026_v10  ;;  %v2041_v25 = vld [vmem:[#allocation5 + $0x30] sm:$0xff]   ;;  %v2045_v29 = vld [vmem:[#allocation5 + $0x38] sm:$0xff]   ;;  %v2049_v32 = vld [vmem:[#allocation2 + $0x4] ss:$28 sps:$4 sm:$0xff]  }
  0x41   :  { %1723 = vmatpush3.bf16.msra.mxu0 %v2025_v9  ;;  %v2042_v26 = vld [vmem:[#allocation5 + $0xf0] sm:$0xff]   ;;  %v2046_v30 = vld [vmem:[#allocation5 + $0xf8] sm:$0xff]   ;;  %902 = vmatprep.mubr.bf16.mxu0 %v2049_v32  ;;  %v2051_v34 = vld [vmem:[#allocation5 + $0x140] sm:$0xff]  }
  0x42   :  { %1724 = vmatprep.subr.bf16.mxu0 %v2028_v12  ;;  %v2043_v27 = vld [vmem:[#allocation5 + $0xb0] sm:$0xff]   ;;  %v2047_v31 = vld [vmem:[#allocation2] ss:$28 sps:$4 sm:$0xff]   ;;  %v2052_v35 = vld [vmem:[#allocation2 + $0x8] ss:$28 sps:$4 sm:$0xff]  }
  0x43   :  { %1787 = vmatpush3.bf16.msra.mxu1 %v2027_v11  ;;  %v2050_v33 = vld [vmem:[#allocation5 + $0xb8] sm:$0xff]   ;;  %v2054_v36 = vld [vmem:[#allocation2 + $0xc] ss:$28 sps:$4 sm:$0xff]   ;;  %v2055_v37 = vld [vmem:[#allocation5 + $0x100] sm:$0xff]  }
  0x44   :  { %1788 = vmatprep.subr.bf16.mxu1 %v2030_v14  ;;  %999 = vmatprep.mubr.bf16.mxu1 %v2054_v36  ;;  %v2056_v38 = vld [vmem:[#allocation2 + $0x3c] ss:$28 sps:$4 sm:$0xff]   ;;  %v2059_v40 = vld [vmem:[#allocation5 + $0x148] sm:$0xff]   ;;  %v2060_v41 = vld [vmem:[#allocation2 + $0x44] ss:$28 sps:$4 sm:$0xff]  }
  0x45   :  { %1725 = vmatpush3.bf16.msra.mxu0 %v2029_v13  ;;  %v2058_v39 = vld [vmem:[#allocation2 + $0x38] ss:$28 sps:$4 sm:$0xff]   ;;  %v2062_v42 = vld [vmem:[#allocation5 + $0x108] sm:$0xff]   ;;  %v2063_v43 = vld [vmem:[#allocation2 + $0x40] ss:$28 sps:$4 sm:$0xff]  }
  0x46   :  { %1726 = vmatprep.subr.bf16.mxu0 %v2032_v16  ;;  %v2064_v44 = vld [vmem:[#allocation2 + $0x74] ss:$28 sps:$4 sm:$0xff]   ;;  %v2068_v46 = vld [vmem:[#allocation2 + $0x7c] ss:$28 sps:$4 sm:$0xff]   ;;  %v2072_v49 = vld [vmem:[#allocation2 + $0xac] ss:$28 sps:$4 sm:$0xff]  }
  0x47   :  { %1789 = vmatpush3.bf16.msra.mxu1 %v2031_v15  ;;  %v2067_v45 = vld [vmem:[#allocation5 + $0x150] sm:$0xff]   ;;  %v2075_v50 = vld [vmem:[#allocation5 + $0x158] sm:$0xff]   ;;  %v2083_v54 = vld [vmem:[#allocation5 + $0x160] sm:$0xff]  }
  0x48   :  { %1790 = vmatprep.subr.bf16.mxu1 %v2034_v18  ;;  %v2070_v47 = vld [vmem:[#allocation5 + $0x110] sm:$0xff]   ;;  %v2078_v52 = vld [vmem:[#allocation5 + $0x118] sm:$0xff]   ;;  %v2074_v55 = vld [vmem:[#allocation2 + $0xa8] ss:$28 sps:$4 sm:$0xff]  }
  0x49   :  { %1727 = vmatpush3.bf16.msra.mxu0 %v2033_v17  ;;  %v2066_v48 = vld [vmem:[#allocation2 + $0x70] ss:$28 sps:$4 sm:$0xff]   ;;  %v2071_v51 = vld [vmem:[#allocation2 + $0x78] ss:$28 sps:$4 sm:$0xff]   ;;  %v2086_v56 = vld [vmem:[#allocation5 + $0x120] sm:$0xff]  }
  0x4a   :  { %1728 = vmatprep.subr.bf16.mxu0 %v2036_v20  ;;  %v2076_v53 = vld [vmem:[#allocation2 + $0xb4] ss:$28 sps:$4 sm:$0xff]   ;;  %v2080_v57 = vld [vmem:[#allocation2 + $0xe4] ss:$28 sps:$4 sm:$0xff]   ;;  %v2084_v60 = vld [vmem:[#allocation2 + $0xec] ss:$28 sps:$4 sm:$0xff]  }
  0x4b   :  { %1791 = vmatpush3.bf16.msra.mxu1 %v2035_v19  ;;  %v2088_v58 = vld [vmem:[#allocation5 + $0x180] sm:$0xff]   ;;  %v2079_v59 = vld [vmem:[#allocation2 + $0xb0] ss:$28 sps:$4 sm:$0xff]   ;;  %v2089_v3 = vld [vmem:[#allocation2 + $0x11c] ss:$28 sps:$4 sm:$0xff]  }
  0x4c   :  { %1792 = vmatprep.subr.bf16.mxu1 %v2038_v22  ;;  %v2092_v61 = vld [vmem:[#allocation5 + $0x168] sm:$0xff]   ;;  %v2098_v0 = vld [vmem:[#allocation5 + $0x190] sm:$0xff]   ;;  %v2082_v1 = vld [vmem:[#allocation2 + $0xe0] ss:$28 sps:$4 sm:$0xff]  }
  0x4d   :  { %1729 = vmatpush3.bf16.msra.mxu0 %v2037_v21  ;;  %v2093_v62 = vld [vmem:[#allocation5 + $0x188] sm:$0xff]   ;;  %v2102_v4 = vld [vmem:[#allocation5 + $0x170] sm:$0xff]   ;;  %v2103_v5 = vld [vmem:[#allocation5 + $0x198] sm:$0xff]  }
  0x4e   :  { %1730 = vmatprep.subr.bf16.mxu0 %v2040_v24  ;;  %v2096_v63 = vld [vmem:[#allocation5 + $0x128] sm:$0xff]   ;;  %v2094_v6 = vld [vmem:[#allocation2 + $0x124] ss:$28 sps:$4 sm:$0xff]   ;;  %v2106_v7 = vld [vmem:[#allocation5 + $0x130] sm:$0xff]  }
  0x4f   :  { %1793 = vmatpush3.bf16.msra.mxu1 %v2039_v23  ;;  %v2087_v2 = vld [vmem:[#allocation2 + $0xe8] ss:$28 sps:$4 sm:$0xff]   ;;  %v2091_v9 = vld [vmem:[#allocation2 + $0x118] ss:$28 sps:$4 sm:$0xff]   ;;  %v2097_v11 = vld [vmem:[#allocation2 + $0x120] ss:$28 sps:$4 sm:$0xff]  }
  0x50   :  { %1794 = vmatprep.subr.bf16.mxu1 %v2042_v26  ;;  %v2108_v8 = vld [vmem:[#allocation5 + $0x1a0] sm:$0xff]   ;;  %v2112_v10 = vld [vmem:[#allocation5 + $0x178] sm:$0xff]   ;;  %v2099_v12 = vld [vmem:[#allocation2 + $0x154] ss:$28 sps:$4 sm:$0xff]  }
  0x51   :  { %1731 = vmatpush3.bf16.msra.mxu0 %v2041_v25  ;;  %v2113_v13 = vld [vmem:[#allocation5 + $0x1a8] sm:$0xff]   ;;  %v2116_v14 = vld [vmem:[#allocation5 + $0x138] sm:$0xff]   ;;  %v2118_v16 = vld [vmem:[#allocation5 + $0x1b0] sm:$0xff]  }
  0x52   :  { %1732 = vmatprep.subr.bf16.mxu0 %v2044_v28  ;;  %v2104_v15 = vld [vmem:[#allocation2 + $0x15c] ss:$28 sps:$4 sm:$0xff]   ;;  %v2101_v17 = vld [vmem:[#allocation2 + $0x150] ss:$28 sps:$4 sm:$0xff]   ;;  %v2111_v22 = vld [vmem:[#allocation2 + $0x188] ss:$28 sps:$4 sm:$0xff]  }
  0x53   :  { %1795 = vmatpush3.bf16.msra.mxu1 %v2043_v27  ;;  %v2109_v18 = vld [vmem:[#allocation2 + $0x18c] ss:$28 sps:$4 sm:$0xff]   ;;  %v2122_v19 = vld [vmem:[#allocation5 + $0x1b8] sm:$0xff]   ;;  %v2114_v21 = vld [vmem:[#allocation2 + $0x194] ss:$28 sps:$4 sm:$0xff]  }
  0x54   :  { %1796 = vmatprep.subr.bf16.mxu1 %v2046_v30  ;;  %v2107_v20 = vld [vmem:[#allocation2 + $0x158] ss:$28 sps:$4 sm:$0xff]   ;;  %v2117_v24 = vld [vmem:[#allocation2 + $0x190] ss:$28 sps:$4 sm:$0xff]   ;;  %v2127_v30 = vld [vmem:[#allocation2 + $0x48] ss:$28 sps:$4 sm:$0xff]  }
  0x55   :  { %1733 = vmatpush3.bf16.msra.mxu0 %v2045_v29  ;;  %v2121_v23 = vld [vmem:[#allocation2 + $0x14] ss:$28 sps:$4 sm:$0xff]   ;;  %v2125_v27 = vld [vmem:[#allocation2 + $0x4c] ss:$28 sps:$4 sm:$0xff]   ;;  %v2132_v32 = vld [vmem:[#allocation2 + $0xc0] ss:$28 sps:$4 sm:$0xff]  }
  0x56   :  { %1846 = vmatprep.subr.bf16.mxu0 %v2051_v34  ;;  %v2123_v25 = vld [vmem:[#allocation2 + $0x18] ss:$28 sps:$4 sm:$0xff]   ;;  %v2119_v26 = vld [vmem:[#allocation2 + $0x10] ss:$28 sps:$4 sm:$0xff]   ;;  %v2131_v29 = vld [vmem:[#allocation2 + $0x88] ss:$28 sps:$4 sm:$0xff]  }
  0x57   :  { %1797 = vmatpush3.bf16.msra.mxu1 %v2050_v33  ;;  %v2124_v28 = vld [vmem:[#allocation2 + $0x50] ss:$28 sps:$4 sm:$0xff]   ;;  %v2139_v33 = vld [vmem:[#allocation2 + $0xf8] ss:$28 sps:$4 sm:$0xff]   ;;  %v2130_v34 = vld [vmem:[#allocation2 + $0x80] ss:$28 sps:$4 sm:$0xff]  }
  0x58   :  { %903 = vmatmul.mubr.bf16.vlgmr.msra.gmra.mrb[0].mxu0 %v2047_v31  ;;  %1942 = vmatprep.subr.bf16.mxu1 %v2088_v58  ;;  %v2128_v31 = vld [vmem:[#allocation2 + $0x84] ss:$28 sps:$4 sm:$0xff]   ;;  %v2140_v36 = vld [vmem:[#allocation2 + $0x130] ss:$28 sps:$4 sm:$0xff]  }
  0x59   :  { %1847 = vmatpush3.bf16.msra.mxu0 %v2055_v37  ;;  %910 = vmatprep.mubr.bf16.mxu0 %v2056_v38  ;;  %v2147_v37 = vld [vmem:[#allocation2 + $0x168] ss:$28 sps:$4 sm:$0xff]   ;;  %v2135_v38 = vld [vmem:[#allocation2 + $0xb8] ss:$28 sps:$4 sm:$0xff]  }
  0x5a   :  { %1000 = vmatmul.mubr.bf16.vlgmr.msra.gmra.mrb[0].mxu1 %v2052_v35  ;;  %1848 = vmatprep.subr.bf16.mxu0 %v2059_v40  ;;  %v2133_v35 = vld [vmem:[#allocation2 + $0xbc] ss:$28 sps:$4 sm:$0xff]  }
  0x5b   :  { %1007 = vmatprep.mubr.bf16.mxu1 %v2060_v41  ;;  %1943 = vmatpush3.bf16.msra.mxu1 %v2088_v58  ;;  %v2148_v40 = vld [vmem:[#allocation2 + $0x1a0] ss:$28 sps:$4 sm:$0xff]   ;;  %v2138_v41 = vld [vmem:[#allocation2 + $0xf0] ss:$28 sps:$4 sm:$0xff]  }
  0x5c   :  { %1944 = vmatprep.subr.bf16.mxu1 %v2093_v62 }
  0x5d   :  { %1849 = vmatpush3.bf16.msra.mxu0 %v2062_v42  ;;  %v2141_v42 = vld [vmem:[#allocation2 + $0x12c] ss:$28 sps:$4 sm:$0xff]  }
  0x5e   :  { %1850 = vmatprep.subr.bf16.mxu0 %v2067_v45  ;;  %v2146_v45 = vld [vmem:[#allocation2 + $0x160] ss:$28 sps:$4 sm:$0xff]  }
  0x5f   :  { %1945 = vmatpush3.bf16.msra.mxu1 %v2093_v62 }
  0x60   :  { %911 = vmatmul.mubr.bf16.gmra.mrb[4].mxu0 %v2058_v39  ;;  %1946 = vmatprep.subr.bf16.mxu1 %v2098_v0  ;;  %v2136_v39 = vld [vmem:[#allocation2 + $0xf4] ss:$28 sps:$4 sm:$0xff]  }
  0x61   :  { %918 = vmatprep.mubr.bf16.mxu0 %v2064_v44  ;;  %1851 = vmatpush3.bf16.msra.mxu0 %v2070_v47  ;;  %v2144_v44 = vld [vmem:[#allocation2 + $0x164] ss:$28 sps:$4 sm:$0xff]   ;;  %v2151_v47 = vld [vmem:[#allocation2 + $0x198] ss:$28 sps:$4 sm:$0xff]  }
  0x62   :  { %1008 = vmatmul.mubr.bf16.gmra.mrb[4].mxu1 %v2063_v43  ;;  %1852 = vmatprep.subr.bf16.mxu0 %v2075_v50  ;;  %v2143_v43 = vld [vmem:[#allocation2 + $0x128] ss:$28 sps:$4 sm:$0xff]   ;;  %v2154_v50 = vld [vmem:[#allocation7 + $0x10] sm:$0xff]  }
  0x63   :  { %1015 = vmatprep.mubr.bf16.mxu1 %v2068_v46  ;;  %1947 = vmatpush3.bf16.msra.mxu1 %v2098_v0  ;;  %v2149_v46 = vld [vmem:[#allocation2 + $0x19c] ss:$28 sps:$4 sm:$0xff]  }
  0x64   :  { %1948 = vmatprep.subr.bf16.mxu1 %v2103_v5 }
  0x65   :  { %1853 = vmatpush3.bf16.msra.mxu0 %v2078_v52  ;;  %v2156_v52 = vld [vmem:[#allocation7 + $0x20] sm:$0xff]  }
  0x66   :  { %1854 = vmatprep.subr.bf16.mxu0 %v2083_v54  ;;  %v2158_v54 = vld [vmem:[#allocation7 + $0x30] sm:$0xff]  }
  0x67   :  { %1949 = vmatpush3.bf16.msra.mxu1 %v2103_v5 }
  0x68   :  { %919 = vmatmul.mubr.bf16.gmra.mrb[8].mxu0 %v2066_v48  ;;  %1950 = vmatprep.subr.bf16.mxu1 %v2108_v8  ;;  %v2152_v48 = vld [vmem:[#allocation7] sm:$0xff]  }
  0x69   :  { %926 = vmatprep.mubr.bf16.mxu0 %v2072_v49  ;;  %1855 = vmatpush3.bf16.msra.mxu0 %v2086_v56  ;;  %v2153_v49 = vld [vmem:[#allocation7 + $0x8] sm:$0xff]  }
  0x6a   :  { %1016 = vmatmul.mubr.bf16.gmra.mrb[8].mxu1 %v2071_v51  ;;  %1856 = vmatprep.subr.bf16.mxu0 %v2092_v61  ;;  %v2155_v51 = vld [vmem:[#allocation7 + $0x18] sm:$0xff]  }
  0x6b   :  { %1023 = vmatprep.mubr.bf16.mxu1 %v2076_v53  ;;  %1951 = vmatpush3.bf16.msra.mxu1 %v2108_v8  ;;  %v2157_v53 = vld [vmem:[#allocation7 + $0x28] sm:$0xff]  }
  0x6c   :  { %1952 = vmatprep.subr.bf16.mxu1 %v2113_v13 }
  0x6d   :  { %1857 = vmatpush3.bf16.msra.mxu0 %v2096_v63 }
  0x6e   :  { %1858 = vmatprep.subr.bf16.mxu0 %v2102_v4 }
  0x6f   :  { %1953 = vmatpush3.bf16.msra.mxu1 %v2113_v13 }
  0x70   :  { %927 = vmatmul.mubr.bf16.gmra.mrb[12].mxu0 %v2074_v55  ;;  %1954 = vmatprep.subr.bf16.mxu1 %v2118_v16  ;;  %v2159_v55 = vld [vmem:[#allocation7 + $0x38] sm:$0xff]  }
  0x71   :  { %934 = vmatprep.mubr.bf16.mxu0 %v2080_v57  ;;  %1859 = vmatpush3.bf16.msra.mxu0 %v2106_v7  ;;  %v2403_v57 = vld [vmem:[%s2510_s2] ss:$0 sm:$0xff] }
  0x72   :  { %1024 = vmatmul.mubr.bf16.gmra.mrb[12].mxu1 %v2079_v59  ;;  %1860 = vmatprep.subr.bf16.mxu0 %v2112_v10 }
  0x73   :  { %1031 = vmatprep.mubr.bf16.mxu1 %v2084_v60  ;;  %1955 = vmatpush3.bf16.msra.mxu1 %v2118_v16 }
  0x74   :  { %1956 = vmatprep.subr.bf16.mxu1 %v2122_v19 }
  0x75   :  { %1861 = vmatpush3.bf16.msra.mxu0 %v2116_v14 }
  0x77   :  { %1957 = vmatpush3.bf16.msra.mxu1 %v2122_v19 }
  0x78   :  { %935 = vmatmul.mubr.bf16.gmra.mrb[16].mxu0 %v2082_v1  ;;  %1974 = vmatprep.subr.bf16.mxu1 %v2152_v48 }
  0x79   :  { %942 = vmatprep.mubr.bf16.mxu0 %v2089_v3 }
  0x7a   :  { %1032 = vmatmul.mubr.bf16.gmra.mrb[16].mxu1 %v2087_v2 }
  0x7b   :  { %1039 = vmatprep.mubr.bf16.mxu1 %v2094_v6 }
  0x80   :  { %943 = vmatmul.mubr.bf16.gmra.mrb[20].mxu0 %v2091_v9 }
  0x81   :  { %950 = vmatprep.mubr.bf16.mxu0 %v2099_v12 }
  0x82   :  { %1040 = vmatmul.mubr.bf16.gmra.mrb[20].mxu1 %v2097_v11 }
  0x83   :  { %1047 = vmatprep.mubr.bf16.mxu1 %v2104_v15 }
  0x88   :  { %951 = vmatmul.mubr.bf16.gmra.mrb[24].mxu0 %v2101_v17 }
  0x89   :  { %958 = vmatprep.mubr.bf16.mxu0 %v2109_v18 }
  0x8a   :  { %1048 = vmatmul.mubr.bf16.gmra.mrb[24].mxu1 %v2107_v20 }
  0x8b   :  { %1055 = vmatprep.mubr.bf16.mxu1 %v2114_v21 }
  0x90   :  { %959 = vmatmul.mubr.bf16.gmra.mrb[28].mxu0 %v2111_v22 }
  0x91   :  { %1096 = vmatprep.mubr.bf16.mxu0 %v2121_v23 }
  0x92   :  { %1056 = vmatmul.mubr.bf16.gmra.mrb[28].mxu1 %v2117_v24 }
  0x93   :  { %1958 = vmatprep.mubr.bf16.mxu1 %v2123_v25 }
  0x98   :  { %1097 = vmatmul.mubr.bf16.vlgmr.msra.gmra.mrb[32].mxu0 %v2119_v26 }
  0x99   :  { %1104 = vmatprep.mubr.bf16.mxu0 %v2125_v27 }
  0x9a   :  { %1959 = vmatmul.mubr.bf16.vlgmr.msra.gmra.mrb[32].mxu1 %v2124_v28 }
  0x9b   :  { %1962 = vmatprep.mubr.bf16.mxu1 %v2131_v29  ;;  %1975 = vmatpush3.bf16.msra.mxu1 %v2152_v48 }
  0x9c   :  { %1976 = vmatprep.subr.bf16.mxu1 %v2153_v49 }
  0x9f   :  { %1977 = vmatpush3.bf16.msra.mxu1 %v2153_v49 }
  0xa0   :  { %1105 = vmatmul.mubr.bf16.gmra.mrb[36].mxu0 %v2127_v30  ;;  %1978 = vmatprep.subr.bf16.mxu1 %v2154_v50 }
  0xa1   :  { %1112 = vmatprep.mubr.bf16.mxu0 %v2128_v31 }
  0xa2   :  { %1963 = vmatmul.mubr.bf16.gmra.mrb[36].mxu1 %v2132_v32 }
  0xa3   :  { %1966 = vmatprep.mubr.bf16.mxu1 %v2139_v33  ;;  %1979 = vmatpush3.bf16.msra.mxu1 %v2154_v50 }
  0xa4   :  { %1980 = vmatprep.subr.bf16.mxu1 %v2155_v51 }
  0xa7   :  { %1981 = vmatpush3.bf16.msra.mxu1 %v2155_v51 }
  0xa8   :  { %1113 = vmatmul.mubr.bf16.gmra.mrb[40].mxu0 %v2130_v34  ;;  %1982 = vmatprep.subr.bf16.mxu1 %v2156_v52 }
  0xa9   :  { %1120 = vmatprep.mubr.bf16.mxu0 %v2133_v35 }
  0xaa   :  { %1967 = vmatmul.mubr.bf16.gmra.mrb[40].mxu1 %v2140_v36 }
  0xab   :  { %1970 = vmatprep.mubr.bf16.mxu1 %v2147_v37  ;;  %1983 = vmatpush3.bf16.msra.mxu1 %v2156_v52 }
  0xac   :  { %1984 = vmatprep.subr.bf16.mxu1 %v2157_v53 }
  0xaf   :  { %1985 = vmatpush3.bf16.msra.mxu1 %v2157_v53 }
  0xb0   :  { %1121 = vmatmul.mubr.bf16.gmra.mrb[44].mxu0 %v2135_v38  ;;  %1986 = vmatprep.subr.bf16.mxu1 %v2158_v54 }
  0xb1   :  { %1128 = vmatprep.mubr.bf16.mxu0 %v2136_v39 }
  0xb2   :  { %1971 = vmatmul.mubr.bf16.gmra.mrb[44].mxu1 %v2148_v40 }
  0xb3   :  { %1987 = vmatpush3.bf16.msra.mxu1 %v2158_v54 }
  0xb4   :  { %1988 = vmatprep.subr.bf16.mxu1 %v2159_v55 }
  0xb7   :  { %1989 = vmatpush3.bf16.msra.mxu1 %v2159_v55 }
  0xb8   :  { %1129 = vmatmul.mubr.bf16.gmra.mrb[48].mxu0 %v2138_v41 }
  0xb9   :  { %1136 = vmatprep.mubr.bf16.mxu0 %v2141_v42 }
  0xc0   :  { %1137 = vmatmul.mubr.bf16.gmra.mrb[52].mxu0 %v2143_v43 }
  0xc1   :  { %1144 = vmatprep.mubr.bf16.mxu0 %v2144_v44 }
  0xc8   :  { %1145 = vmatmul.mubr.bf16.gmra.mrb[56].mxu0 %v2146_v45 }
  0xc9   :  { %1152 = vmatprep.mubr.bf16.mxu0 %v2149_v46 }
  0xd0   :  { %1153 = vmatmul.mubr.bf16.gmra.mrb[60].mxu0 %v2151_v47 }
 0x12b   :  { %v1734_v56 = vpop.f32.mrb[0].mxu0 }
 0x12c   :  { %v1735_v58 = vpop.f32.mrb[1].mxu0 }
 0x12d   :  { %v1736_v59 = vadd.f32 %v1735_v58, %v1734_v56  ;;  %v1737_v60 = vpop.f32.mrb[2].mxu0  ;;  %v1798_v61 = vpop.f32.mrb[0].mxu1 }
 0x12e   :  { %v1738_v62 = vpop.f32.mrb[3].mxu0  ;;  %v1799_v1 = vpop.f32.mrb[1].mxu1 }
 0x12f   :  { %v905_v63 = vadd.f32 %v1736_v59, %v2403_v57  ;;  %v1739_v0 = vadd.f32 %v1738_v62, %v1737_v60  ;;  %v1800_v2 = vadd.f32 %v1799_v1, %v1798_v61  ;;  %v1801_v3 = vpop.f32.mrb[2].mxu1 }
 0x130   :  { %v1802_v5 = vpop.f32.mrb[3].mxu1 }
 0x131   :  { %v908_v4 = vadd.f32 %v1739_v0, %v2403_v57  ;;  %v2407_v6 = vadd.f32 %v1800_v2, %v905_v63  ;;  %v1803_v7 = vadd.f32 %v1802_v5, %v1801_v3 }
 0x133   :  { %v1740_v8 = vpop.f32.mrb[4].mxu0  ;;  %v2409_v9 = vadd.f32 %v1803_v7, %v908_v4 }
 0x134   :  { %v1741_v10 = vpop.f32.mrb[5].mxu0 }
 0x135   :  { %v1742_v11 = vadd.f32 %v1741_v10, %v1740_v8  ;;  %v1743_v12 = vpop.f32.mrb[6].mxu0  ;;  %v1804_v13 = vpop.f32.mrb[4].mxu1 }
 0x136   :  { %v1744_v14 = vpop.f32.mrb[7].mxu0  ;;  %v1805_v17 = vpop.f32.mrb[5].mxu1 }
 0x137   :  { %v913_v15 = vadd.f32 %v1742_v11, %v2403_v57  ;;  %v1745_v16 = vadd.f32 %v1744_v14, %v1743_v12  ;;  %v1806_v18 = vadd.f32 %v1805_v17, %v1804_v13  ;;  %v1807_v19 = vpop.f32.mrb[6].mxu1 }
 0x138   :  { %v1808_v21 = vpop.f32.mrb[7].mxu1 }
 0x139   :  { %v916_v20 = vadd.f32 %v1745_v16, %v2403_v57  ;;  %v2413_v22 = vadd.f32 %v1806_v18, %v913_v15  ;;  %v1809_v23 = vadd.f32 %v1808_v21, %v1807_v19 }
 0x13b   :  { %v1746_v24 = vpop.f32.mrb[8].mxu0  ;;  %v2415_v25 = vadd.f32 %v1809_v23, %v916_v20 }
 0x13c   :  { %v1747_v26 = vpop.f32.mrb[9].mxu0 }
 0x13d   :  { %v1748_v27 = vadd.f32 %v1747_v26, %v1746_v24  ;;  %v1749_v28 = vpop.f32.mrb[10].mxu0  ;;  %v1810_v29 = vpop.f32.mrb[8].mxu1 }
 0x13e   :  { %v1750_v30 = vpop.f32.mrb[11].mxu0  ;;  %v1811_v33 = vpop.f32.mrb[9].mxu1 }
 0x13f   :  { %v921_v31 = vadd.f32 %v1748_v27, %v2403_v57  ;;  %v1751_v32 = vadd.f32 %v1750_v30, %v1749_v28  ;;  %v1812_v34 = vadd.f32 %v1811_v33, %v1810_v29  ;;  %v1813_v35 = vpop.f32.mrb[10].mxu1 }
 0x140   :  { %v1814_v37 = vpop.f32.mrb[11].mxu1 }
 0x141   :  { %v924_v36 = vadd.f32 %v1751_v32, %v2403_v57  ;;  %v2419_v38 = vadd.f32 %v1812_v34, %v921_v31  ;;  %v1815_v39 = vadd.f32 %v1814_v37, %v1813_v35 }
 0x143   :  { %v1752_v40 = vpop.f32.mrb[12].mxu0  ;;  %v2421_v41 = vadd.f32 %v1815_v39, %v924_v36 }
 0x144   :  { %v1753_v42 = vpop.f32.mrb[13].mxu0 }
 0x145   :  { %v1754_v43 = vadd.f32 %v1753_v42, %v1752_v40  ;;  %v1755_v44 = vpop.f32.mrb[14].mxu0  ;;  %v1816_v45 = vpop.f32.mrb[12].mxu1 }
 0x146   :  { %v1756_v46 = vpop.f32.mrb[15].mxu0  ;;  %v1817_v49 = vpop.f32.mrb[13].mxu1 }
 0x147   :  { %v929_v47 = vadd.f32 %v1754_v43, %v2403_v57  ;;  %v1757_v48 = vadd.f32 %v1756_v46, %v1755_v44  ;;  %v1818_v50 = vadd.f32 %v1817_v49, %v1816_v45  ;;  %v1819_v51 = vpop.f32.mrb[14].mxu1 }
 0x148   :  { %v1820_v53 = vpop.f32.mrb[15].mxu1 }
 0x149   :  { %v932_v52 = vadd.f32 %v1757_v48, %v2403_v57  ;;  %v2425_v54 = vadd.f32 %v1818_v50, %v929_v47  ;;  %v1821_v55 = vadd.f32 %v1820_v53, %v1819_v51 }
 0x14b   :  { %v1758_v56 = vpop.f32.mrb[16].mxu0  ;;  %v2427_v58 = vadd.f32 %v1821_v55, %v932_v52 }
 0x14c   :  { %v1759_v59 = vpop.f32.mrb[17].mxu0 }
 0x14d   :  { %v1760_v60 = vadd.f32 %v1759_v59, %v1758_v56  ;;  %v1761_v61 = vpop.f32.mrb[18].mxu0  ;;  %v1822_v62 = vpop.f32.mrb[16].mxu1 }
 0x14e   :  { %v1762_v63 = vpop.f32.mrb[19].mxu0  ;;  %v1823_v2 = vpop.f32.mrb[17].mxu1 }
 0x14f   :  { %v937_v0 = vadd.f32 %v1760_v60, %v2403_v57  ;;  %v1763_v1 = vadd.f32 %v1762_v63, %v1761_v61  ;;  %v1824_v3 = vadd.f32 %v1823_v2, %v1822_v62  ;;  %v1825_v4 = vpop.f32.mrb[18].mxu1 }
 0x150   :  { %v1826_v7 = vpop.f32.mrb[19].mxu1 }
 0x151   :  { %v940_v5 = vadd.f32 %v1763_v1, %v2403_v57  ;;  %v2431_v8 = vadd.f32 %v1824_v3, %v937_v0  ;;  %v1827_v10 = vadd.f32 %v1826_v7, %v1825_v4 }
 0x153   :  { %v1764_v11 = vpop.f32.mrb[20].mxu0  ;;  %v2433_v12 = vadd.f32 %v1827_v10, %v940_v5 }
 0x154   :  { %v1765_v13 = vpop.f32.mrb[21].mxu0 }
 0x155   :  { %v1766_v14 = vadd.f32 %v1765_v13, %v1764_v11  ;;  %v1767_v15 = vpop.f32.mrb[22].mxu0  ;;  %v1828_v16 = vpop.f32.mrb[20].mxu1 }
 0x156   :  { %v1768_v17 = vpop.f32.mrb[23].mxu0  ;;  %v1829_v20 = vpop.f32.mrb[21].mxu1 }
 0x157   :  { %v945_v18 = vadd.f32 %v1766_v14, %v2403_v57  ;;  %v1769_v19 = vadd.f32 %v1768_v17, %v1767_v15  ;;  %v1830_v21 = vadd.f32 %v1829_v20, %v1828_v16  ;;  %v1831_v23 = vpop.f32.mrb[22].mxu1 }
 0x158   :  { %v1832_v26 = vpop.f32.mrb[23].mxu1 }
 0x159   :  { %v948_v24 = vadd.f32 %v1769_v19, %v2403_v57  ;;  %v2437_v27 = vadd.f32 %v1830_v21, %v945_v18  ;;  %v1833_v28 = vadd.f32 %v1832_v26, %v1831_v23 }
 0x15b   :  { %v1770_v29 = vpop.f32.mrb[24].mxu0  ;;  %v2439_v30 = vadd.f32 %v1833_v28, %v948_v24 }
 0x15c   :  { %v1771_v31 = vpop.f32.mrb[25].mxu0 }
 0x15d   :  { %v1772_v32 = vadd.f32 %v1771_v31, %v1770_v29  ;;  %v1773_v33 = vpop.f32.mrb[26].mxu0  ;;  %v1834_v34 = vpop.f32.mrb[24].mxu1 }
 0x15e   :  { %v1774_v35 = vpop.f32.mrb[27].mxu0  ;;  %v1835_v39 = vpop.f32.mrb[25].mxu1 }
 0x15f   :  { %v953_v36 = vadd.f32 %v1772_v32, %v2403_v57  ;;  %v1775_v37 = vadd.f32 %v1774_v35, %v1773_v33  ;;  %v1836_v40 = vadd.f32 %v1835_v39, %v1834_v34  ;;  %v1837_v42 = vpop.f32.mrb[26].mxu1 }
 0x160   :  { %v1838_v44 = vpop.f32.mrb[27].mxu1 }
 0x161   :  { %v956_v43 = vadd.f32 %v1775_v37, %v2403_v57  ;;  %v2443_v45 = vadd.f32 %v1836_v40, %v953_v36  ;;  %v1839_v46 = vadd.f32 %v1838_v44, %v1837_v42 }
 0x163   :  { %v1776_v47 = vpop.f32.mrb[28].mxu0  ;;  %v2445_v48 = vadd.f32 %v1839_v46, %v956_v43 }
 0x164   :  { %v1777_v49 = vpop.f32.mrb[29].mxu0 }
 0x165   :  { %v1778_v50 = vadd.f32 %v1777_v49, %v1776_v47  ;;  %v1779_v51 = vpop.f32.mrb[30].mxu0  ;;  %v1840_v52 = vpop.f32.mrb[28].mxu1 }
 0x166   :  { %v1780_v53 = vpop.f32.mrb[31].mxu0  ;;  %v1841_v59 = vpop.f32.mrb[29].mxu1 }
 0x167   :  { %v961_v55 = vadd.f32 %v1778_v50, %v2403_v57  ;;  %v1781_v56 = vadd.f32 %v1780_v53, %v1779_v51  ;;  %v1842_v60 = vadd.f32 %v1841_v59, %v1840_v52  ;;  %v1843_v61 = vpop.f32.mrb[30].mxu1 }
 0x168   :  { %v1844_v63 = vpop.f32.mrb[31].mxu1 }
 0x169   :  { %v964_v62 = vadd.f32 %v1781_v56, %v2403_v57  ;;  %v2449_v0 = vadd.f32 %v1842_v60, %v961_v55  ;;  %v1845_v1 = vadd.f32 %v1844_v63, %v1843_v61 }
 0x16b   :  { %v1862_v2 = vpop.f32.mrb[32].mxu0  ;;  %v2451_v3 = vadd.f32 %v1845_v1, %v964_v62 }
 0x16c   :  { %v1863_v4 = vpop.f32.mrb[33].mxu0 }
 0x16d   :  { %v1864_v5 = vadd.f32 %v1863_v4, %v1862_v2  ;;  %v1865_v7 = vpop.f32.mrb[34].mxu0  ;;  %v1960_v11 = vpop.f32.mrb[32].mxu1 }
 0x16e   :  { %v1866_v10 = vpop.f32.mrb[35].mxu0  ;;  %v1195_v15 = vpop.f32.mrb[33].mxu1 }
 0x16f   :  { %v1867_v13 = vadd.f32 %v1866_v10, %v1865_v7  ;;  %v1099_v14 = vadd.f32 %v1864_v5, %v2407_v6  ;;  %v1961_v16 = vpop.f32.mrb[34].mxu1 }
 0x170   :  { %v1198_v18 = vpop.f32.mrb[35].mxu1 }
 0x171   :  { %v1196_v17 = vadd.f32 %v1195_v15, %v1099_v14  ;;  %v1102_v57 = vadd.f32 %v1867_v13, %v2409_v9 }
 0x173   :  { %v1258_v19 = vmul.f32 0.1, %v1196_v17  ;;  %v1199_v20 = vadd.f32 %v1198_v18, %v1102_v57  ;;  %v1868_v21 = vpop.f32.mrb[36].mxu0 }
 0x174   :  { %v1869_v23 = vpop.f32.mrb[37].mxu0 }
 0x175   :  { %v1259_v24 = vmul.f32 0.1, %v1199_v20  ;;  %v1870_v26 = vadd.f32 %v1869_v23, %v1868_v21  ;;  %v1871_v28 = vpop.f32.mrb[38].mxu0  ;;  %v1964_v31 = vpop.f32.mrb[36].mxu1  ;;  %v1274_v32 = vmax.f32 %v1196_v17, %v1258_v19 }
 0x176   :  { %v1872_v29 = vpop.f32.mrb[39].mxu0  ;;  %v1211_v35 = vpop.f32.mrb[37].mxu1 }
 0x177   :  { %v1275_v33 = vmax.f32 %v1199_v20, %v1259_v24  ;;  %v1107_v34 = vadd.f32 %v1870_v26, %v2413_v22  ;;  %v1873_v6 = vadd.f32 %v1872_v29, %v1871_v28  ;;  %v1965_v36 = vpop.f32.mrb[38].mxu1 }
 0x178   :  { %v1214_v40 = vpop.f32.mrb[39].mxu1 }
 0x179   :  { %v1204_v37 = vadd.f32 %v1960_v11, %v1107_v34  ;;  %v1110_v9 = vadd.f32 %v1873_v6, %v2415_v25  ;;  %v1290_v39 = vpack.c.bf16 %v1275_v33, %v1274_v32 }
 0x17b   :  { %v1260_v42 = vmul.f32 0.1, %v1204_v37  ;;  %v1207_v43 = vadd.f32 %v1961_v16, %v1110_v9  ;;  %v1874_v44 = vpop.f32.mrb[40].mxu0  ;;  %1990 = vmatprep.mubr.bf16.mxu1 %v1290_v39 }
 0x17c   :  { %v1875_v46 = vpop.f32.mrb[41].mxu0 }
 0x17d   :  { %v1261_v47 = vmul.f32 0.1, %v1207_v43  ;;  %v1876_v49 = vadd.f32 %v1875_v46, %v1874_v44  ;;  %v1877_v50 = vpop.f32.mrb[42].mxu0  ;;  %v1968_v52 = vpop.f32.mrb[40].mxu1  ;;  %v1276_v53 = vmax.f32 %v1204_v37, %v1260_v42 }
 0x17e   :  { %v1878_v51 = vpop.f32.mrb[43].mxu0  ;;  %v1227_v59 = vpop.f32.mrb[41].mxu1 }
 0x17f   :  { %v1277_v22 = vmax.f32 %v1207_v43, %v1261_v47  ;;  %v1879_v55 = vadd.f32 %v1878_v51, %v1877_v50  ;;  %v1115_v56 = vadd.f32 %v1876_v49, %v2419_v38  ;;  %v1969_v60 = vpop.f32.mrb[42].mxu1 }
 0x180   :  { %v1230_v63 = vpop.f32.mrb[43].mxu1 }
 0x181   :  { %v1291_v25 = vpack.c.bf16 %v1277_v22, %v1276_v53  ;;  %v1212_v61 = vadd.f32 %v1211_v35, %v1115_v56  ;;  %v1118_v62 = vadd.f32 %v1879_v55, %v2421_v41 }
 0x183   :  { %v1262_v1 = vmul.f32 0.1, %v1212_v61  ;;  %v1215_v2 = vadd.f32 %v1214_v40, %v1118_v62  ;;  %v1880_v4 = vpop.f32.mrb[44].mxu0  ;;  %1991 = vmatmul.mubr.bf16.vlgmr.msra.gmra.mrb[48].mxu1 %v1291_v25 }
 0x184   :  { %v1881_v5 = vpop.f32.mrb[45].mxu0 }
 0x185   :  { %v1263_v7 = vmul.f32 0.1, %v1215_v2  ;;  %v1882_v10 = vadd.f32 %v1881_v5, %v1880_v4  ;;  %v1883_v11 = vpop.f32.mrb[46].mxu0  ;;  %v2459_v14 = vpop.f32.mrb[44].mxu1  ;;  %v1278_v15 = vmax.f32 %v1212_v61, %v1262_v1 }
 0x186   :  { %v1884_v13 = vpop.f32.mrb[47].mxu0  ;;  %v1243_v57 = vpop.f32.mrb[45].mxu1 }
 0x187   :  { %v1279_v38 = vmax.f32 %v1215_v2, %v1263_v7  ;;  %v1123_v16 = vadd.f32 %v1882_v10, %v2425_v54  ;;  %v1885_v17 = vadd.f32 %v1884_v13, %v1883_v11  ;;  %v2462_v18 = vpop.f32.mrb[46].mxu1 }
 0x188   :  { %v1246_v21 = vpop.f32.mrb[47].mxu1 }
 0x189   :  { %v1220_v41 = vadd.f32 %v1964_v31, %v1123_v16  ;;  %v1126_v19 = vadd.f32 %v1885_v17, %v2427_v58  ;;  %v1292_v20 = vpack.c.bf16 %v1279_v38, %v1278_v15 }
 0x18b   :  { %v1264_v23 = vmul.f32 0.1, %v1220_v41  ;;  %v1223_v24 = vadd.f32 %v1965_v36, %v1126_v19  ;;  %v1886_v26 = vpop.f32.mrb[48].mxu0  ;;  %1994 = vmatprep.mubr.bf16.mxu1 %v1292_v20 }
 0x18c   :  { %v1887_v28 = vpop.f32.mrb[49].mxu0 }
 0x18d   :  { %v1265_v29 = vmul.f32 0.1, %v1223_v24  ;;  %v1888_v32 = vadd.f32 %v1887_v28, %v1886_v26  ;;  %v1889_v33 = vpop.f32.mrb[50].mxu0  ;;  %v1280_v35 = vmax.f32 %v1220_v41, %v1264_v23 }
 0x18e   :  { %v1890_v34 = vpop.f32.mrb[51].mxu0 }
 0x18f   :  { %v1891_v6 = vadd.f32 %v1890_v34, %v1889_v33  ;;  %v1131_v54 = vadd.f32 %v1888_v32, %v2431_v8  ;;  %v1281_v37 = vmax.f32 %v1223_v24, %v1265_v29  ;;  %v2478_v33 = vld [vmem:[%s2512_s4] ss:$0 sm:$0xff]  ;;  %s2325_s4 = smov [#allocation8]  }
 0x190   :  { %s1583_s8 = sshll.u32 %s2325_s4, 4  ;;  %s1584_s8 = int_to_ptr.vmem [resolvable:$true] %s1583_s8 }
 0x191   :  { %v1228_v9 = vadd.f32 %v1227_v59, %v1131_v54  ;;  %v1134_v31 = vadd.f32 %v1891_v6, %v2433_v12  ;;  %v1293_v58 = vpack.c.bf16 %v1281_v37, %v1280_v35  ;;  %s2290_s9 = scalar_lea.vmem %s1584_s8, 2048  ;;  %p2295_p11 = scmp.lt.s32.totalorder %s1584_s8, %s1584_s8 }
 0x192   :  { %p2291_p10 = scmp.ne.s32.totalorder %s1584_s8, %s2290_s9  ;;  %p2296_p12 = scmp.lt.s32.totalorder %s2290_s9, %s2290_s9 }
 0x193   :  { %v1266_v39 = vmul.f32 0.1, %v1228_v9  ;;  %v1231_v40 = vadd.f32 %v1230_v63, %v1134_v31  ;;  %v1892_v42 = vpop.f32.mrb[52].mxu0  ;;  %1995 = vmatmul.mubr.bf16.gmra.mrb[52].mxu1 %v1293_v58 }
 0x194   :  { %v1893_v36 = vpop.f32.mrb[53].mxu0  ;;  %p2297_p13 = por %p2296_p12, %p2295_p11 }
 0x195   :  { %v1267_v43 = vmul.f32 0.1, %v1231_v40  ;;  %v1894_v44 = vadd.f32 %v1893_v36, %v1892_v42  ;;  %v1895_v46 = vpop.f32.mrb[54].mxu0  ;;  %v1282_v49 = vmax.f32 %v1228_v9, %v1266_v39 }
 0x196   :  { %v1896_v47 = vpop.f32.mrb[55].mxu0  ;;  %p2298_p0 = pnand %p2297_p13, %p2291_p10 }
 0x197   :  { %v1283_v50 = vmax.f32 %v1231_v40, %v1267_v43  ;;  %v1139_v51 = vadd.f32 %v1894_v44, %v2437_v27  ;;  %v1897_v8 = vadd.f32 %v1896_v47, %v1895_v46 }
 0x199   :  { %v1236_v53 = vadd.f32 %v1968_v52, %v1139_v51  ;;  %v1142_v22 = vadd.f32 %v1897_v8, %v2439_v30  ;;  %v1294_v55 = vpack.c.bf16 %v1283_v50, %v1282_v49 }
 0x19b   :  { %v1268_v12 = vmul.f32 0.1, %v1236_v53  ;;  %v1239_v56 = vadd.f32 %v1969_v60, %v1142_v22  ;;  %v1898_v59 = vpop.f32.mrb[56].mxu0  ;;  %1998 = vmatprep.mubr.bf16.mxu1 %v1294_v55 }
 0x19c   :  { %v1899_v25 = vpop.f32.mrb[57].mxu0 }
 0x19d   :  { %v1269_v61 = vmul.f32 0.1, %v1239_v56  ;;  %v1900_v62 = vadd.f32 %v1899_v25, %v1898_v59  ;;  %v1901_v63 = vpop.f32.mrb[58].mxu0  ;;  %v1284_v5 = vmax.f32 %v1236_v53, %v1268_v12 }
 0x19e   :  { %v1902_v1 = vpop.f32.mrb[59].mxu0 }
 0x19f   :  { %v1903_v2 = vadd.f32 %v1902_v1, %v1901_v63  ;;  %v1147_v4 = vadd.f32 %v1900_v62, %v2443_v45  ;;  %v1285_v7 = vmax.f32 %v1239_v56, %v1269_v61 }
 0x1a1   :  { %v1244_v27 = vadd.f32 %v1243_v57, %v1147_v4  ;;  %v1150_v52 = vadd.f32 %v1903_v2, %v2445_v48  ;;  %v1295_v10 = vpack.c.bf16 %v1285_v7, %v1284_v5 }
 0x1a3   :  { %v1270_v30 = vmul.f32 0.1, %v1244_v27  ;;  %v1247_v11 = vadd.f32 %v1246_v21, %v1150_v52  ;;  %v1904_v13 = vpop.f32.mrb[60].mxu0  ;;  %1999 = vmatmul.mubr.bf16.gmra.mrb[56].mxu1 %v1295_v10 }
 0x1a4   :  { %v1905_v60 = vpop.f32.mrb[61].mxu0 }
 0x1a5   :  { %v1271_v15 = vmul.f32 0.1, %v1247_v11  ;;  %v1906_v38 = vadd.f32 %v1905_v60, %v1904_v13  ;;  %v1907_v16 = vpop.f32.mrb[62].mxu0  ;;  %v1286_v41 = vmax.f32 %v1244_v27, %v1270_v30 }
 0x1a6   :  { %v1908_v17 = vpop.f32.mrb[63].mxu0 }
 0x1a7   :  { %v1287_v19 = vmax.f32 %v1247_v11, %v1271_v15  ;;  %v1155_v20 = vadd.f32 %v1906_v38, %v2449_v0  ;;  %v1909_v45 = vadd.f32 %v1908_v17, %v1907_v16 }
 0x1a9   :  { %v1252_v23 = vadd.f32 %v2459_v14, %v1155_v20  ;;  %v1158_v57 = vadd.f32 %v1909_v45, %v2451_v3  ;;  %v1296_v48 = vpack.c.bf16 %v1287_v19, %v1286_v41 }
 0x1ab   :  { %v1272_v24 = vmul.f32 0.1, %v1252_v23  ;;  %v1255_v21 = vadd.f32 %v2462_v18, %v1158_v57  ;;  %2002 = vmatprep.mubr.bf16.mxu1 %v1296_v48 }
 0x1ad   :  { %v1273_v26 = vmul.f32 0.1, %v1255_v21  ;;  %v1288_v28 = vmax.f32 %v1252_v23, %v1272_v24 }
 0x1af   :  { %v1289_v29 = vmax.f32 %v1255_v21, %v1273_v26 }
 0x1b1   :  { %v1297_v32 = vpack.c.bf16 %v1289_v29, %v1288_v28 }
 0x1b3   :  { %2003 = vmatmul.mubr.bf16.gmra.mrb[60].mxu1 %v1297_v32 }
 0x256   :  { %v1992_v0 = vpop.f32.mrb[48].mxu1 }
 0x257   :  { %v1412_v14 = vadd.f32 %v1992_v0, %v2478_v33  ;;  %v1403_v34 = vpop.f32.mrb[49].mxu1 }
 0x258   :  { %v1404_v3 = vadd.f32 %v2478_v33, %v1403_v34  ;;  %v1993_v6 = vpop.f32.mrb[50].mxu1 }
 0x259   :  { %v1468_v54 = vsub.f32 0.0, %v1412_v14  ;;  %v1415_v18 = vadd.f32 %v1993_v6, %v2478_v33  ;;  %v1406_v35 = vpop.f32.mrb[51].mxu1 }
 0x25a   :  { %v1466_v37 = vsub.f32 0.0, %v1404_v3  ;;  %v1407_v9 = vadd.f32 %v2478_v33, %v1406_v35 }
 0x25b   :  { %v1486_v31 = vmul.f32 1.442695, %v1468_v54  ;;  %v1469_v58 = vsub.f32 0.0, %v1415_v18 }
 0x25c   :  { %v1482_v39 = vmul.f32 1.442695, %v1466_v37  ;;  %v1467_v40 = vsub.f32 0.0, %v1407_v9 }
 0x25d   :  { %2160 = vpow2.f32 %v1486_v31  ;;  %v1488_v42 = vmul.f32 1.442695, %v1469_v58 }
 0x25e   :  { %2162 = vpow2.f32 %v1482_v39  ;;  %v1484_v36 = vmul.f32 1.442695, %v1467_v40 }
 0x25f   :  { %2164 = vpow2.f32 %v1488_v42 }
 0x260   :  { %2166 = vpow2.f32 %v1484_v36 }
 0x266   :  { %v1996_v43 = vpop.f32.mrb[52].mxu1 }
 0x267   :  { %v2161_v44 = vpop.eup %2160  ;;  %v1428_v46 = vadd.f32 %v1996_v43, %v2478_v33  ;;  %v1419_v47 = vpop.f32.mrb[53].mxu1 }
 0x268   :  { %v2163_v49 = vpop.eup %2162  ;;  %v1516_v50 = vadd.f32 1.0, %v2161_v44  ;;  %v1420_v51 = vadd.f32 %v2478_v33, %v1419_v47  ;;  %v1997_v8 = vpop.f32.mrb[54].mxu1 }
 0x269   :  { %v2165_v53 = vpop.eup %2164  ;;  %v1514_v22 = vadd.f32 1.0, %v2163_v49  ;;  %v1472_v55 = vsub.f32 0.0, %v1428_v46  ;;  %v1431_v12 = vadd.f32 %v1997_v8, %v2478_v33  ;;  %v1422_v56 = vpop.f32.mrb[55].mxu1 }
 0x26a   :  { %v2167_v59 = vpop.eup %2166  ;;  %2168 = vrcp.f32 %v1516_v50  ;;  %v1517_v25 = vadd.f32 1.0, %v2165_v53  ;;  %v1470_v61 = vsub.f32 0.0, %v1420_v51  ;;  %v1423_v62 = vadd.f32 %v2478_v33, %v1422_v56 }
 0x26b   :  { %2170 = vrcp.f32 %v1514_v22  ;;  %v1515_v63 = vadd.f32 1.0, %v2167_v59  ;;  %v1494_v1 = vmul.f32 1.442695, %v1472_v55  ;;  %v1473_v2 = vsub.f32 0.0, %v1431_v12 }
 0x26c   :  { %2172 = vrcp.f32 %v1517_v25  ;;  %v1490_v4 = vmul.f32 1.442695, %v1470_v61  ;;  %v1471_v5 = vsub.f32 0.0, %v1423_v62 }
 0x26d   :  { %2174 = vrcp.f32 %v1515_v63  ;;  %v1496_v7 = vmul.f32 1.442695, %v1473_v2 }
 0x26e   :  { %2176 = vpow2.f32 %v1494_v1  ;;  %v1492_v27 = vmul.f32 1.442695, %v1471_v5 }
 0x26f   :  { %2178 = vpow2.f32 %v1490_v4 }
 0x270   :  { %2180 = vpow2.f32 %v1496_v7 }
 0x271   :  { %2182 = vpow2.f32 %v1492_v27 }
 0x274   :  { %v2169_v52 = vpop.eup %2168 }
 0x275   :  { %v2171_v10 = vpop.eup %2170  ;;  %1564 = vst [vmem:[#allocation8 + $0x10] sm:$0xff] %v2169_v52 }
 0x276   :  { %v2173_v30 = vpop.eup %2172  ;;  %1562 = vst [vmem:[#allocation8] sm:$0xff] %v2171_v10  ;;  %v2000_v11 = vpop.f32.mrb[56].mxu1 }
 0x277   :  { %v2175_v13 = vpop.eup %2174  ;;  %1565 = vst [vmem:[#allocation8 + $0x18] sm:$0xff] %v2173_v30  ;;  %v1444_v60 = vadd.f32 %v2000_v11, %v2478_v33  ;;  %v1435_v15 = vpop.f32.mrb[57].mxu1 }
 0x278   :  { %v2177_v38 = vpop.eup %2176  ;;  %1563 = vst [vmem:[#allocation8 + $0x8] sm:$0xff] %v2175_v13  ;;  %v1436_v16 = vadd.f32 %v2478_v33, %v1435_v15  ;;  %v2001_v17 = vpop.f32.mrb[58].mxu1 }
 0x279   :  { %v2179_v41 = vpop.eup %2178  ;;  %v1520_v19 = vadd.f32 1.0, %v2177_v38  ;;  %v1476_v20 = vsub.f32 0.0, %v1444_v60  ;;  %v1447_v45 = vadd.f32 %v2001_v17, %v2478_v33  ;;  %v1438_v23 = vpop.f32.mrb[59].mxu1 }
 0x27a   :  { %v2181_v57 = vpop.eup %2180  ;;  %v1518_v48 = vadd.f32 1.0, %v2179_v41  ;;  %v1474_v24 = vsub.f32 0.0, %v1436_v16  ;;  %v1439_v21 = vadd.f32 %v2478_v33, %v1438_v23 }
 0x27b   :  { %v2183_v26 = vpop.eup %2182  ;;  %2184 = vrcp.f32 %v1520_v19  ;;  %v1521_v28 = vadd.f32 1.0, %v2181_v57  ;;  %v1502_v29 = vmul.f32 1.442695, %v1476_v20  ;;  %v1477_v32 = vsub.f32 0.0, %v1447_v45 }
 0x27c   :  { %2186 = vrcp.f32 %v1518_v48  ;;  %v1519_v0 = vadd.f32 1.0, %v2183_v26  ;;  %v1498_v14 = vmul.f32 1.442695, %v1474_v24  ;;  %v1475_v34 = vsub.f32 0.0, %v1439_v21 }
 0x27d   :  { %2188 = vrcp.f32 %v1521_v28  ;;  %v1504_v3 = vmul.f32 1.442695, %v1477_v32 }
 0x27e   :  { %2190 = vrcp.f32 %v1519_v0  ;;  %v1500_v6 = vmul.f32 1.442695, %v1475_v34 }
 0x27f   :  { %2192 = vpow2.f32 %v1502_v29 }
 0x280   :  { %2194 = vpow2.f32 %v1498_v14 }
 0x281   :  { %2196 = vpow2.f32 %v1504_v3 }
 0x282   :  { %2198 = vpow2.f32 %v1500_v6 }
 0x285   :  { %v2185_v54 = vpop.eup %2184 }
 0x286   :  { %v2187_v18 = vpop.eup %2186  ;;  %1568 = vst [vmem:[#allocation8 + $0x30] sm:$0xff] %v2185_v54  ;;  %v2004_v35 = vpop.f32.mrb[60].mxu1 }
 0x287   :  { %v2189_v37 = vpop.eup %2188  ;;  %1566 = vst [vmem:[#allocation8 + $0x20] sm:$0xff] %v2187_v18  ;;  %v1460_v9 = vadd.f32 %v2004_v35, %v2478_v33  ;;  %v1451_v31 = vpop.f32.mrb[61].mxu1 }
 0x288   :  { %v2191_v58 = vpop.eup %2190  ;;  %1569 = vst [vmem:[#allocation8 + $0x38] sm:$0xff] %v2189_v37  ;;  %v1452_v39 = vadd.f32 %v2478_v33, %v1451_v31  ;;  %v2005_v40 = vpop.f32.mrb[62].mxu1 }
 0x289   :  { %v2193_v42 = vpop.eup %2192  ;;  %1567 = vst [vmem:[#allocation8 + $0x28] sm:$0xff] %v2191_v58  ;;  %v1480_v36 = vsub.f32 0.0, %v1460_v9  ;;  %v1463_v43 = vadd.f32 %v2005_v40, %v2478_v33  ;;  %v1454_v44 = vpop.f32.mrb[63].mxu1 }
 0x28a   :  { %v2195_v46 = vpop.eup %2194  ;;  %v1524_v47 = vadd.f32 1.0, %v2193_v42  ;;  %v1478_v49 = vsub.f32 0.0, %v1452_v39  ;;  %v1455_v50 = vadd.f32 %v2478_v33, %v1454_v44 }
 0x28b   :  { %v2197_v51 = vpop.eup %2196  ;;  %v1522_v8 = vadd.f32 1.0, %v2195_v46  ;;  %v1481_v53 = vsub.f32 0.0, %v1463_v43  ;;  %v1510_v12 = vmul.f32 1.442695, %v1480_v36 }
 0x28c   :  { %v2199_v22 = vpop.eup %2198  ;;  %2200 = vrcp.f32 %v1524_v47  ;;  %v1525_v55 = vadd.f32 1.0, %v2197_v51  ;;  %v1479_v56 = vsub.f32 0.0, %v1455_v50  ;;  %v1506_v25 = vmul.f32 1.442695, %v1478_v49 }
 0x28d   :  { %2202 = vrcp.f32 %v1522_v8  ;;  %v1523_v59 = vadd.f32 1.0, %v2199_v22  ;;  %v1512_v61 = vmul.f32 1.442695, %v1481_v53 }
 0x28e   :  { %2204 = vrcp.f32 %v1525_v55  ;;  %v1508_v62 = vmul.f32 1.442695, %v1479_v56 }
 0x28f   :  { %2206 = vrcp.f32 %v1523_v59 }
 0x290   :  { %2208 = vpow2.f32 %v1510_v12 }
 0x291   :  { %2210 = vpow2.f32 %v1506_v25 }
 0x292   :  { %2212 = vpow2.f32 %v1512_v61 }
 0x293   :  { %2214 = vpow2.f32 %v1508_v62 }
 0x296   :  { %v2201_v33 = vpop.eup %2200 }
 0x297   :  { %v2203_v63 = vpop.eup %2202  ;;  %1572 = vst [vmem:[#allocation8 + $0x50] sm:$0xff] %v2201_v33 }
 0x298   :  { %v2205_v1 = vpop.eup %2204  ;;  %1570 = vst [vmem:[#allocation8 + $0x40] sm:$0xff] %v2203_v63 }
 0x299   :  { %v2207_v2 = vpop.eup %2206  ;;  %1573 = vst [vmem:[#allocation8 + $0x58] sm:$0xff] %v2205_v1 }
 0x29a   :  { %v2209_v4 = vpop.eup %2208  ;;  %1571 = vst [vmem:[#allocation8 + $0x48] sm:$0xff] %v2207_v2 }
 0x29b   :  { %v2211_v5 = vpop.eup %2210  ;;  %v1528_v7 = vadd.f32 1.0, %v2209_v4 }
 0x29c   :  { %v2213_v27 = vpop.eup %2212  ;;  %v1526_v52 = vadd.f32 1.0, %v2211_v5 }
 0x29d   :  { %v2215_v10 = vpop.eup %2214  ;;  %2216 = vrcp.f32 %v1528_v7  ;;  %v1529_v30 = vadd.f32 1.0, %v2213_v27 }
 0x29e   :  { %2218 = vrcp.f32 %v1526_v52  ;;  %v1527_v11 = vadd.f32 1.0, %v2215_v10 }
 0x29f   :  { %2220 = vrcp.f32 %v1529_v30 }
 0x2a0   :  { %2222 = vrcp.f32 %v1527_v11 }
 0x2a7   :  { %v2217_v13 = vpop.eup %2216 }
 0x2a8   :  { %v2219_v60 = vpop.eup %2218  ;;  %1576 = vst [vmem:[#allocation8 + $0x70] sm:$0xff] %v2217_v13 }
 0x2a9   :  { %v2221_v15 = vpop.eup %2220  ;;  %1574 = vst [vmem:[#allocation8 + $0x60] sm:$0xff] %v2219_v60 }
 0x2aa   :  { %v2223_v38 = vpop.eup %2222  ;;  %1577 = vst [vmem:[#allocation8 + $0x78] sm:$0xff] %v2221_v15 }
 0x2ab   :  { %1575 = vst [vmem:[#allocation8 + $0x68] sm:$0xff] %v2223_v38 }
 0x2ac   :  { %2301 = shalt.err (!%p2298_p0)
}
 0x2ad   :  { %s2302_s12 = scalar_lea.hbm %s2513_s5, 2048 }
 0x2ae   :  { %p2303_p1 = scmp.ne.s32.totalorder %s2513_s5, %s2302_s12  ;;  %p2306_p2 = scmp.lt.u32.totalorder %s2302_s12, %s2513_s5 }
 0x2b0   :  { %p2308_p3 = pnand %p2306_p2, %p2303_p1 }
 0x2b2   :  { %2311 = shalt.err (!%p2308_p3)
}
 0x2b3   :  { %s2326_s1 = smov 128   ;;  %s2327_s17 = smov 8  }
 0x2b4   :  { %1589 = dma.vmem_to_hbm [thread:$0]  %s1584_s8, 2048, %s2513_s5, [#allocation4], %s2326_s1, %s2326_s1, %s2327_s17  }
 0x2b5   :  { %2316 = dma.done.wait [#allocation4], 2048  }
 0x2b6   :  { %2317 = vsyncadd [#allocation4], 4294965248 }
 0x2b7   :  { %1593 = vsyncpa [#allocation3], 1 }
 0x2b8   :  { %1594 = vsyncpa [#allocation6], 1 }
 0x2b9   :  { %1595 = vsyncpa [#allocation4], 1 }

</bundles_post_ra>
